<compile_context>
chip_gen: v7x
topology: tpu7x:2x2x1
jax: 0.10.0
libtpu: 0.0.40
codegen_flags: <defaults>
</compile_context>

<pallas_src>
import jax
import jax.numpy as jnp
from jax.experimental import pallas as pl
from jax.experimental.pallas import tpu as pltpu


def _intervention_kernel(x_ref, a_ref, b_ref, o_ref):
    # x_ref: (tm, D)   row panel of the flattened hidden states (full K)
    # a_ref: (D, tn)   full-K column panel of A (tn == D when A is resident)
    # b_ref: (1, tn)   folded f32 bias, broadcast over rows
    # o_ref: (tm, tn)  output tile, written exactly once per grid step
    o_ref[...] = (
        jnp.dot(x_ref[...], a_ref[...], preferred_element_type=jnp.float32)
        + b_ref[...]
    ).astype(o_ref.dtype)


def _vmem_capacity_bytes():
    try:
        return int(pltpu.get_tpu_info().vmem_capacity_bytes)
    except Exception:
        return 64 << 20  # conservative fallback (v7x per-TC VMEM)


def _pick_tiles(M, D, itemsize, vmem_budget):
    """Choose full-K tiles (tm, tn) under a conservative VMEM budget.

    The budget assumes double-buffering of every operand (worst case), so the
    chosen plan is safe even if Pallas allocates two buffers for a block whose
    index never changes.
    """
    if M <= 512:
        tm_cands = [M]  # single row panel; full-dim block is always legal
    else:
        tm_cands = [512, 256, 128]  # multiples of 8/16/32 -> legal for all dtypes

    if D % 128 == 0:
        tn_cands = [D] + [c for c in (1024, 512, 256, 128) if c < D and D % c == 0]
    else:
        # TODO(synk): pad N of A/bias/out to a 128 multiple for lane-dense
        # stores when D is not a multiple of 128 (unusual hidden sizes).
        tn_cands = [D]

    def vmem_need(tm, tn):
        return 2 * itemsize * (tm * D + D * tn + tm * tn) + 2 * 4 * tn

    # Prefer a fully resident A (tn == D, DMA'd from HBM exactly once),
    # shrinking the row panel if needed, before falling back to column panels.
    for tn in tn_cands:
        for tm in tm_cands:
            if vmem_need(tm, tn) <= vmem_budget:
                return tm, tn
    return tm_cands[-1], tn_cands[-1]


def intervention_forward(hidden_states, mean_0, mean_1, A, alpha=1.0):
    """Pallas implementation of InterventionModule.forward.

    alpha is a static config constant on the PyTorch module (plain attribute);
    it is treated as a static Python float here.
    """
    alpha_f = float(alpha)
    if alpha_f == 0.0:
        return hidden_states

    orig_shape = hidden_states.shape
    orig_dtype = hidden_states.dtype
    D = orig_shape[-1]
    x = hidden_states.reshape(-1, D)
    M = x.shape[0]

    # Match the PyTorch fp16 path: A participates in the matmul in the
    # activation dtype (no full f32 copy of A is materialized; the single
    # narrow copy feeds both the bias GEMV and the main matmul).
    a_op = A if A.dtype == orig_dtype else A.astype(orig_dtype)

    # Fold the means into one f32 bias:
    #   (x - a*m0) @ A + a*m1  ==  x @ A + (a*m1 - (a*m0) @ A)
    m0 = (alpha_f * mean_0.astype(jnp.float32)).astype(orig_dtype).reshape(1, D)
    bias = (
        alpha_f * mean_1.astype(jnp.float32).reshape(1, D)
        - jnp.dot(m0, a_op, preferred_element_type=jnp.float32)
    )

    itemsize = jnp.dtype(orig_dtype).itemsize
    vmem_cap = _vmem_capacity_bytes()
    vmem_budget = int(vmem_cap * 0.7)                 # soft budget for tiling
    vmem_limit = min(int(vmem_cap * 0.9), 120 << 20)  # raise scoped VMEM limit

    tm, tn = _pick_tiles(M, D, itemsize, vmem_budget)
    mt = pl.cdiv(M, tm)
    nt = pl.cdiv(D, tn)

    # Grid order: when A is resident (nt == 1, constant block index -> single
    # DMA) or re-streaming A is cheaper, keep rows outer so x is fetched once;
    # otherwise put columns outer so A is fetched once and x is re-streamed.
    if nt == 1 or mt * D * D <= nt * M * D:
        grid = (mt, nt)
        x_spec = pl.BlockSpec((tm, D), lambda i, j: (i, 0))
        a_spec = pl.BlockSpec((D, tn), lambda i, j: (0, j))
        b_spec = pl.BlockSpec((1, tn), lambda i, j: (0, j))
        o_spec = pl.BlockSpec((tm, tn), lambda i, j: (i, j))
    else:
        grid = (nt, mt)
        x_spec = pl.BlockSpec((tm, D), lambda j, i: (i, 0))
        a_spec = pl.BlockSpec((D, tn), lambda j, i: (0, j))
        b_spec = pl.BlockSpec((1, tn), lambda j, i: (0, j))
        o_spec = pl.BlockSpec((tm, tn), lambda j, i: (i, j))

    out = pl.pallas_call(
        _intervention_kernel,
        out_shape=jax.ShapeDtypeStruct((M, D), orig_dtype),
        grid_spec=pltpu.PrefetchScalarGridSpec(
            num_scalar_prefetch=0,
            grid=grid,
            in_specs=[x_spec, a_spec, b_spec],
            out_specs=o_spec,
        ),
        compiler_params=pltpu.CompilerParams(
            dimension_semantics=("parallel", "parallel"),
            vmem_limit_bytes=vmem_limit,
        ),
    )(x, a_op, bias)

    return out.reshape(orig_shape)


if __name__ == "__main__":
    # Small deterministic setup: batch=2, seq=8, hidden=32.
    B, S, D = 2, 8, 32
    alpha = 1.0

    key = jax.random.PRNGKey(0)
    k_h, k_m0, k_m1, k_a = jax.random.split(key, 4)

    hidden_states = jax.random.normal(k_h, (B, S, D), dtype=jnp.float32)
    mean_0 = jax.random.normal(k_m0, (D,), dtype=jnp.float32)
    mean_1 = jax.random.normal(k_m1, (D,), dtype=jnp.float32)
    A = jax.random.normal(k_a, (D, D), dtype=jnp.float32) / jnp.sqrt(D)

    out = intervention_forward(hidden_states, mean_0, mean_1, A, alpha=alpha)
    out = jax.block_until_ready(out)

    # Pure-JAX reference of the original (unfolded) math.
    x = hidden_states.reshape(-1, D)
    ref = (alpha * mean_1 + (x - alpha * mean_0) @ A).reshape(hidden_states.shape)
    assert jnp.allclose(out, ref, atol=1e-4, rtol=1e-4), "mismatch vs reference"

    print("KERNEL_OK")
</pallas_src>

<mosaic_0001>
module attributes {stable_mosaic.version = 11 : i64} {
  func.func @_intervention_kernel(%arg0: i32, %arg1: i32, %arg2: memref<16x32xf32, #tpu.memory_space<vmem>>, %arg3: memref<32x32xf32, #tpu.memory_space<vmem>>, %arg4: memref<1x32xf32, #tpu.memory_space<vmem>>, %arg5: memref<16x32xf32, #tpu.memory_space<vmem>>) attributes {dimension_semantics = [#tpu.dimension_semantics<parallel>, #tpu.dimension_semantics<parallel>], iteration_bounds = array<i64: 1, 1>, scalar_prefetch = 0 : i64, scratch_operands = 0 : i64, tpu.core_type = #tpu.core_type<tc>, window_params = [{transform_indices = @transform_0, window_bounds = array<i64: 16, 32>}, {transform_indices = @transform_1, window_bounds = array<i64: 32, 32>}, {transform_indices = @transform_2, window_bounds = array<i64: 1, 32>}, {transform_indices = @transform_3, window_bounds = array<i64: 16, 32>}]} {
    %c0 = arith.constant 0 : index
    %c0_0 = arith.constant 0 : index
    %0 = vector.load %arg2[%c0, %c0_0] : memref<16x32xf32, #tpu.memory_space<vmem>>, vector<16x32xf32>
    %c0_1 = arith.constant 0 : index
    %c0_2 = arith.constant 0 : index
    %1 = vector.load %arg3[%c0_1, %c0_2] : memref<32x32xf32, #tpu.memory_space<vmem>>, vector<32x32xf32>
    %cst = arith.constant dense<0.000000e+00> : vector<16x32xf32>
    %2 = tpu.matmul %0, %1, %cst {dimension_numbers = #tpu.dot_dimension_numbers<[1], [0], [0], [1], [0, 0, 1, 1], [], []>} : vector<16x32xf32>, vector<32x32xf32>, vector<16x32xf32> -> vector<16x32xf32>
    %c0_3 = arith.constant 0 : index
    %c0_4 = arith.constant 0 : index
    %3 = vector.load %arg4[%c0_3, %c0_4] : memref<1x32xf32, #tpu.memory_space<vmem>>, vector<1x32xf32>
    %4 = vector.broadcast %3 : vector<1x32xf32> to vector<16x32xf32>
    %5 = arith.addf %2, %4 : vector<16x32xf32>
    %c0_5 = arith.constant 0 : index
    %c0_6 = arith.constant 0 : index
    %6 = vector.load %arg5[%c0_5, %c0_6] : memref<16x32xf32, #tpu.memory_space<vmem>>, vector<16x32xf32>
    tpu.vector_store %arg5[%c0_5, %c0_6], %5 {strides = array<i32>} : memref<16x32xf32, #tpu.memory_space<vmem>>, vector<16x32xf32>,
    return
  }
  func.func @transform_0(%arg0: i32, %arg1: i32) -> (i32, i32) {
    %c0_i32 = arith.constant 0 : i32
    %c0_i32_0 = arith.constant 0 : i32
    return %arg0, %c0_i32 : i32, i32
  }
  func.func @transform_1(%arg0: i32, %arg1: i32) -> (i32, i32) {
    %c0_i32 = arith.constant 0 : i32
    %c0_i32_0 = arith.constant 0 : i32
    return %c0_i32, %arg1 : i32, i32
  }
  func.func @transform_2(%arg0: i32, %arg1: i32) -> (i32, i32) {
    %c0_i32 = arith.constant 0 : i32
    %c0_i32_0 = arith.constant 0 : i32
    return %c0_i32, %arg1 : i32, i32
  }
  func.func @transform_3(%arg0: i32, %arg1: i32) -> (i32, i32) {
    %c0_i32 = arith.constant 0 : i32
    return %arg0, %arg1 : i32, i32
  }
}

</mosaic_0001>

<bundles_post_ra>
// kernel: tpu_custom_call.1
= control target key start
LH: loop header
LB: loop body
LE: loop exit
PB: predicated region body
PF: predicated region fallthrough
CT: control target
= control target key end

     0   :  { %8 = vsyncpa [#allocation3], 0  ;;  %s340_s0 = inlined_call_operand.hbm [shape: f32[16,32], index: 0, kind: input, shape index: {}]   ;;  %s341_s1 = inlined_call_operand.hbm [shape: f32[32,32], index: 1, kind: input, shape index: {}]   ;;  %s342_s2 = inlined_call_operand.vmem [shape: f32[1,32], index: 2, kind: input, shape index: {}]   ;;  %s343_s3 = inlined_call_operand.hbm [shape: f32[16,32], index: 3, kind: output, shape index: {}]  }
   0x1   :  { %9 = vsyncpa [#allocation6], 0 }
   0x2   :  { %10 = vsyncpa [#allocation4], 0  ;;  %s263_s12 = smov [#allocation2]   ;;  %s191_s16 = scalar_lea.hbm %s340_s0, 256 }
   0x3   :  { %s16_s13 = sshll.u32 %s263_s12, 4  ;;  %p192_p0 = scmp.ne.s32.totalorder %s340_s0, %s191_s16  ;;  %s17_s13 = int_to_ptr.vmem [resolvable:$true] %s16_s13 }
   0x4   :  { %p195_p1 = scmp.lt.u32.totalorder %s191_s16, %s340_s0 }
   0x6   :  { %p197_p2 = pnand %p195_p1, %p192_p0 }
   0x8   :  { %200 = shalt.err (!%p197_p2)
}
   0x9   :  { %s201_s21 = scalar_lea.vmem %s17_s13, 256  ;;  %p206_p4 = scmp.lt.s32.totalorder %s17_s13, %s17_s13 }
   0xa   :  { %p202_p3 = scmp.ne.s32.totalorder %s17_s13, %s201_s21  ;;  %p207_p5 = scmp.lt.s32.totalorder %s201_s21, %s201_s21 }
   0xc   :  { %p208_p6 = por %p207_p5, %p206_p4 }
   0xe   :  { %p209_p7 = pnand %p208_p6, %p202_p3 }
  0x10   :  { %212 = shalt.err (!%p209_p7)
}
  0x11   :  { %s264_s22 = smov 128   ;;  %s265_s23 = smov 8  }
  0x12   :  { %22 = dma.hbm_to_vmem [thread:$0]  %s340_s0, 256, %s17_s13, [#allocation3], %s264_s22, %s264_s22, %s265_s23  }
  0x13   :  { %s266_s26 = smov [#allocation5]   ;;  %s213_s30 = scalar_lea.hbm %s341_s1, 512 }
  0x14   :  { %s28_s27 = sshll.u32 %s266_s26, 4  ;;  %p214_p8 = scmp.ne.s32.totalorder %s341_s1, %s213_s30  ;;  %s29_s27 = int_to_ptr.vmem [resolvable:$true] %s28_s27 }
  0x15   :  { %p217_p9 = scmp.lt.u32.totalorder %s213_s30, %s341_s1 }
  0x17   :  { %p219_p10 = pnand %p217_p9, %p214_p8 }
  0x19   :  { %222 = shalt.err (!%p219_p10)
}
  0x1a   :  { %s223_s8 = scalar_lea.vmem %s29_s27, 512  ;;  %p228_p12 = scmp.lt.s32.totalorder %s29_s27, %s29_s27 }
  0x1b   :  { %p224_p11 = scmp.ne.s32.totalorder %s29_s27, %s223_s8  ;;  %p229_p13 = scmp.lt.s32.totalorder %s223_s8, %s223_s8 }
  0x1d   :  { %p230_p0 = por %p229_p13, %p228_p12 }
  0x1f   :  { %p231_p1 = pnand %p230_p0, %p224_p11 }
  0x21   :  { %234 = shalt.err (!%p231_p1)
}
  0x22   :  { %34 = dma.hbm_to_vmem [thread:$0]  %s341_s1, 512, %s29_s27, [#allocation6], %s264_s22, %s264_s22, %s265_s23  }
  0x23   :  { %257 = dma.done.wait [#allocation3], 256  }
  0x24   :  { %258 = vsyncadd [#allocation3], 4294967040 }
  0x25   :  { %259 = dma.done.wait [#allocation6], 512  }
  0x26   :  { %260 = vsyncadd [#allocation6], 4294966784  ;;  %vm56_vm0 = vcmask 261120   ;;  %v45_v0 = vld [vmem:[#allocation5] sm:$0xff]  ;;  %v46_v1 = vld [vmem:[#allocation5 + $0x8] sm:$0xff]  ;;  %s267_s11 = smov [#allocation7]  }
  0x27   :  { %v47_v2 = vld [vmem:[#allocation5 + $0x10] sm:$0xff]  ;;  %v178_v3 = vpack.c.bf16 %v46_v1, %v45_v0  ;;  %v48_v4 = vld [vmem:[#allocation5 + $0x18] sm:$0xff]  ;;  %s145_s12 = sshll.u32 %s267_s11, 4  ;;  %s146_s12 = int_to_ptr.vmem [resolvable:$true] %s145_s12 }
  0x28   :  { %v43_v5 = vld [vmem:[#allocation2] sm:$0xff]  ;;  %v182_v6 = vpack.c.bf16 %v48_v4, %v47_v2  ;;  %v44_v7 = vld [vmem:[#allocation2 + $0x8] sm:$0xff]  ;;  %s235_s13 = scalar_lea.vmem %s146_s12, 256  ;;  %p240_p3 = scmp.lt.s32.totalorder %s146_s12, %s146_s12 }
  0x29   :  { %175 = vmatprep.mubr.msk.f32.mxu0 %vm56_vm0, %v43_v5  ;;  %179 = vmatprep.subr.bf16.mxu0 %v178_v3  ;;  %v158_v8 = vld [vmem:[%s342_s2] ss:$0 sm:$0xff]  ;;  %p236_p2 = scmp.ne.s32.totalorder %s146_s12, %s235_s13  ;;  %p241_p4 = scmp.lt.s32.totalorder %s235_s13, %s235_s13 }
  0x2a   :  { %181 = vmatpush3.bf16.msra.mxu0 %v178_v3 }
  0x2b   :  { %183 = vmatprep.subr.bf16.mxu0 %v182_v6  ;;  %p242_p5 = por %p241_p4, %p240_p3 }
  0x2d   :  { %p243_p6 = pnand %p242_p5, %p236_p2 }
  0x2e   :  { %185 = vmatpush3.bf16.msra.mxu0 %v182_v6 }
  0x31   :  { %176 = vmatmul.mubr.msk.f32.vlgmr.msra.gmra.mrb[0].mxu0 %vm56_vm0, %v44_v7 }
 0x104   :  { %v177_v9 = vpop.f32.mrb[0].mxu0 }
 0x105   :  { %v135_v10 = vadd.f32 %v177_v9, %v158_v8  ;;  %v129_v11 = vpop.f32.mrb[1].mxu0 }
 0x106   :  { %v130_v12 = vadd.f32 %v158_v8, %v129_v11 }
 0x107   :  { %139 = vst.msk [vmem:[#allocation7 + $0x8] sm:$0xff] %vm56_vm0, %v135_v10 }
 0x108   :  { %138 = vst.msk [vmem:[#allocation7] sm:$0xff] %vm56_vm0, %v130_v12 }
 0x109   :  { %246 = shalt.err (!%p243_p6)
}
 0x10a   :  { %s247_s15 = scalar_lea.hbm %s343_s3, 256 }
 0x10b   :  { %p248_p7 = scmp.ne.s32.totalorder %s343_s3, %s247_s15  ;;  %p251_p8 = scmp.lt.u32.totalorder %s247_s15, %s343_s3 }
 0x10d   :  { %p253_p9 = pnand %p251_p8, %p248_p7 }
 0x10f   :  { %256 = shalt.err (!%p253_p9)
}
 0x110   :  { %151 = dma.vmem_to_hbm [thread:$0]  %s146_s12, 256, %s343_s3, [#allocation4], %s264_s22, %s264_s22, %s265_s23  }
 0x111   :  { %261 = dma.done.wait [#allocation4], 256  }
 0x112   :  { %262 = vsyncadd [#allocation4], 4294967040 }
 0x113   :  { %155 = vsyncpa [#allocation3], 1 }
 0x114   :  { %156 = vsyncpa [#allocation6], 1 }
 0x115   :  { %157 = vsyncpa [#allocation4], 1 }

</bundles_post_ra>
